<compile_context>
chip_gen: v6e
topology: v6e:2x2x1
jax: 0.10.0
libtpu: 0.0.40
codegen_flags: <defaults>
</compile_context>

<pallas_src>
import functools

import jax
import jax.numpy as jnp
from jax.experimental import pallas as pl
from jax.experimental.pallas import tpu as pltpu


def _midfc_kernel(seed_ref, x_ref, w_ref, b_ref, o_ref, *,
                  num_layers, dropout_prob, training, eps):
    h = x_ref[...].astype(jnp.float32)

    apply_dropout = training and dropout_prob > 0.0
    if apply_dropout and dropout_prob < 1.0:
        # Per-tile seed: fold in the grid position so every batch tile (and each core
        # on v7x) gets an independent dropout mask stream.
        pltpu.prng_seed(seed_ref[0], pl.program_id(0))
        keep_scale = jnp.float32(1.0 / (1.0 - dropout_prob))
        thresh = jnp.uint32(min(int(round(dropout_prob * (2 ** 32))), 2 ** 32 - 1))

    for l in range(num_layers):                       # L is small & static -> unrolled
        # Linear: h @ W_l + b_l   (W_l stored as (in, out) == torch weight.T)
        y = jnp.dot(h, w_ref[l], preferred_element_type=jnp.float32)
        y = y + b_ref[l]
        # LayerNorm(dim, elementwise_affine=False): normalize over the last dim.
        mean = jnp.mean(y, axis=-1, keepdims=True)
        cent = y - mean
        var = jnp.mean(jnp.square(cent), axis=-1, keepdims=True)
        y = cent * jax.lax.rsqrt(var + eps)           # rsqrt -> EUP slot
        # ReLU
        y = jnp.maximum(y, 0.0)
        # Dropout (training only; identity in eval, exactly like nn.Dropout)
        if apply_dropout:
            if dropout_prob >= 1.0:
                y = jnp.zeros_like(y)
            else:
                bits = pltpu.bitcast(pltpu.prng_random_bits(y.shape), jnp.uint32)
                keep = bits >= thresh                 # P(keep) = 1 - p
                y = jnp.where(keep, y * keep_scale, 0.0)
        h = y

    o_ref[...] = h.astype(o_ref.dtype)


def _pick_batch_tile(B, dim, L, block_batch):
    """Largest batch tile (multiple of 8) whose VMEM footprint fits comfortably."""
    if B <= block_batch:
        return B
    # Budget: resident weights/biases (x2 for safety) + 2x double-buffered (TB, dim)
    # tiles for x and out + ~2 (TB, dim) f32 temporaries inside the kernel + 4 MiB slack,
    # all under the v7x 64 MiB VMEM ceiling.
    weight_bytes = (L * dim * dim + L * dim) * 4
    budget = 64 * 1024 * 1024 - 2 * weight_bytes - (4 << 20)
    per_row_bytes = dim * 4 * 6        # 2x2 pipelined tiles + ~2 live temporaries
    tb_cap = max(8, budget // per_row_bytes)
    tb = min(block_batch, tb_cap)
    return max(8, (tb // 8) * 8)


def midfc(x, w_stack, b_stack, *, dropout_prob=0.1, training=False, seed=0,
          block_batch=1024):
    """Pallas implementation of MidFC.forward.

    x:       (B, dim) float32
    w_stack: (num_layers, dim, dim); layer l computes x @ w_stack[l] + b_stack[l]
             (i.e. w_stack[l] == torch_linear.weight.T)
    b_stack: (num_layers, dim)
    """
    B, dim = x.shape
    L = w_stack.shape[0]
    assert w_stack.shape == (L, dim, dim) and b_stack.shape == (L, dim)
    # TODO(synk): for dim large enough that L*dim*dim*4 bytes no longer fits in VMEM,
    # the weights would need a second (layer / K) grid axis instead of staying resident.

    tb = _pick_batch_tile(B, dim, L, block_batch)
    grid = (pl.cdiv(B, tb),)          # remainder tiles: padded rows' writes are dropped

    seed_arr = jnp.array([seed], dtype=jnp.int32)
    b3 = b_stack.reshape(L, 1, dim)

    kernel = functools.partial(
        _midfc_kernel, num_layers=int(L), dropout_prob=float(dropout_prob),
        training=bool(training), eps=1e-5)

    # Explicit VMEM limit: resident weights (x2) + double-buffered x/out tiles + slack.
    weight_bytes = (L * dim * dim + L * dim) * 4
    tile_bytes = tb * dim * 4
    vmem_limit = min(64 * 1024 * 1024,
                     max(8 * 1024 * 1024,
                         2 * weight_bytes + 8 * tile_bytes + (4 << 20)))

    flops = 2 * B * dim * dim * L + 10 * B * dim * L
    bytes_accessed = (2 * x.size + w_stack.size + b_stack.size) * 4

    grid_spec = pltpu.PrefetchScalarGridSpec(
        num_scalar_prefetch=1,                                        # seed -> SMEM
        grid=grid,
        in_specs=[
            pl.BlockSpec((tb, dim), lambda i, seed: (i, 0)),          # x tile (pipelined)
            pl.BlockSpec((L, dim, dim), lambda i, seed: (0, 0, 0)),   # weights, resident
            pl.BlockSpec((L, 1, dim), lambda i, seed: (0, 0, 0)),     # biases, resident
        ],
        out_specs=pl.BlockSpec((tb, dim), lambda i, seed: (i, 0)),
    )

    return pl.pallas_call(
        kernel,
        out_shape=jax.ShapeDtypeStruct((B, dim), x.dtype),
        grid_spec=grid_spec,
        compiler_params=pltpu.CompilerParams(
            dimension_semantics=("parallel",),
            vmem_limit_bytes=int(vmem_limit)),
        cost_estimate=pl.CostEstimate(
            flops=int(flops), transcendentals=int(B * L),
            bytes_accessed=int(bytes_accessed)),
    )(seed_arr, x, w_stack, b3)


def init_midfc_params(key, dim, num_layers):
    """nn.Linear-style init: U[-1/sqrt(fan_in), 1/sqrt(fan_in)]; weights stored (in, out)."""
    lim = 1.0 / jnp.sqrt(dim)
    keys = jax.random.split(key, 2 * num_layers)
    ws, bs = [], []
    for l in range(num_layers):
        ws.append(jax.random.uniform(keys[2 * l], (dim, dim), jnp.float32, -lim, lim))
        bs.append(jax.random.uniform(keys[2 * l + 1], (dim,), jnp.float32, -lim, lim))
    return jnp.stack(ws), jnp.stack(bs)


def midfc_reference(x, w_stack, b_stack, eps=1e-5):
    """Pure-JAX reference of MidFC.forward (eval mode: dropout == identity)."""
    h = x
    for l in range(w_stack.shape[0]):
        y = h @ w_stack[l] + b_stack[l]
        mean = jnp.mean(y, axis=-1, keepdims=True)
        var = jnp.mean(jnp.square(y - mean), axis=-1, keepdims=True)
        y = (y - mean) / jnp.sqrt(var + eps)
        h = jnp.maximum(y, 0.0)
    return h


if __name__ == "__main__":
    key = jax.random.PRNGKey(0)
    k_x, k_p = jax.random.split(key)

    batch, dim, num_layers = 64, 128, 3     # dim=128 -> lane-dense tiles
    x = jax.random.normal(k_x, (batch, dim), dtype=jnp.float32)
    w_stack, b_stack = init_midfc_params(k_p, dim, num_layers)

    # Eval-mode forward (nn.Dropout is the identity in eval) -> deterministic check.
    out = jax.block_until_ready(
        midfc(x, w_stack, b_stack, dropout_prob=0.1, training=False))

    ref = midfc_reference(x, w_stack, b_stack)
    assert out.shape == (batch, dim)
    # Loose-ish tolerance: MXU f32 matmul decomposition may differ slightly from XLA.
    assert jnp.allclose(out, ref, atol=1e-2, rtol=1e-2), \
        float(jnp.max(jnp.abs(out - ref)))

    # Training-mode dropout uses the TPU hardware PRNG (implemented above for real-TPU
    # runs); it is stochastic so it is not assert-checked here.
    print("KERNEL_OK")
</pallas_src>

<mosaic_0001>
module attributes {stable_mosaic.version = 11 : i64} {
  func.func @_midfc_kernel(%arg0: i32, %arg1: memref<1xi32, #tpu.memory_space<smem>>, %arg2: memref<64x128xf32, #tpu.memory_space<vmem>>, %arg3: memref<3x128x128xf32, #tpu.memory_space<vmem>>, %arg4: memref<3x1x128xf32, #tpu.memory_space<vmem>>, %arg5: memref<64x128xf32, #tpu.memory_space<vmem>>) attributes {dimension_semantics = [#tpu.dimension_semantics<parallel>], iteration_bounds = array<i64: 1>, scalar_prefetch = 1 : i64, scratch_operands = 0 : i64, tpu.core_type = #tpu.core_type<tc>, window_params = [{transform_indices = @transform_0, window_bounds = array<i64: 64, 128>}, {pipeline_mode = #tpu.pipeline_mode<synchronous>, transform_indices = @transform_1, window_bounds = array<i64: 3, 128, 128>}, {pipeline_mode = #tpu.pipeline_mode<synchronous>, transform_indices = @transform_2, window_bounds = array<i64: 3, 1, 128>}, {transform_indices = @transform_3, window_bounds = array<i64: 64, 128>}]} {
    %c0 = arith.constant 0 : index
    %c0_0 = arith.constant 0 : index
    %0 = vector.load %arg2[%c0, %c0_0] : memref<64x128xf32, #tpu.memory_space<vmem>>, vector<64x128xf32>
    %c0_1 = arith.constant 0 : index
    %c0_2 = arith.constant 0 : index
    %c0_3 = arith.constant 0 : index
    %1 = vector.load %arg3[%c0_1, %c0_2, %c0_3] : memref<3x128x128xf32, #tpu.memory_space<vmem>>, vector<1x128x128xf32>
    %2 = vector.shape_cast %1 : vector<1x128x128xf32> to vector<128x128xf32>
    %cst = arith.constant dense<0.000000e+00> : vector<64x128xf32>
    %3 = tpu.matmul %0, %2, %cst {dimension_numbers = #tpu.dot_dimension_numbers<[1], [0], [0], [1], [0, 0, 1, 1], [], []>} : vector<64x128xf32>, vector<128x128xf32>, vector<64x128xf32> -> vector<64x128xf32>
    %c0_4 = arith.constant 0 : index
    %c0_5 = arith.constant 0 : index
    %c0_6 = arith.constant 0 : index
    %4 = vector.load %arg4[%c0_4, %c0_5, %c0_6] : memref<3x1x128xf32, #tpu.memory_space<vmem>>, vector<1x1x128xf32>
    %5 = vector.shape_cast %4 : vector<1x1x128xf32> to vector<1x128xf32>
    %6 = vector.broadcast %5 : vector<1x128xf32> to vector<64x128xf32>
    %7 = arith.addf %3, %6 : vector<64x128xf32>
    %cst_7 = arith.constant dense<0.000000e+00> : vector<64xf32>
    %8 = vector.multi_reduction <add>, %7, %cst_7 [1] : vector<64x128xf32> to vector<64xf32>
    %9 = vector.shape_cast %8 : vector<64xf32> to vector<64x1xf32>
    %cst_8 = arith.constant 1.280000e+02 : f32
    %10 = vector.broadcast %cst_8 : f32 to vector<64x1xf32>
    %11 = arith.divf %9, %10 : vector<64x1xf32>
    %12 = vector.broadcast %11 : vector<64x1xf32> to vector<64x128xf32>
    %13 = arith.subf %7, %12 : vector<64x128xf32>
    %14 = arith.mulf %13, %13 : vector<64x128xf32>
    %cst_9 = arith.constant dense<0.000000e+00> : vector<64xf32>
    %15 = vector.multi_reduction <add>, %14, %cst_9 [1] : vector<64x128xf32> to vector<64xf32>
    %16 = vector.shape_cast %15 : vector<64xf32> to vector<64x1xf32>
    %cst_10 = arith.constant 1.280000e+02 : f32
    %17 = vector.broadcast %cst_10 : f32 to vector<64x1xf32>
    %18 = arith.divf %16, %17 : vector<64x1xf32>
    %cst_11 = arith.constant 9.99999974E-6 : f32
    %19 = vector.broadcast %cst_11 : f32 to vector<64x1xf32>
    %20 = arith.addf %18, %19 : vector<64x1xf32>
    %21 = math.rsqrt %20 : vector<64x1xf32>
    %22 = vector.broadcast %21 : vector<64x1xf32> to vector<64x128xf32>
    %23 = arith.mulf %13, %22 : vector<64x128xf32>
    %cst_12 = arith.constant 0.000000e+00 : f32
    %24 = vector.broadcast %cst_12 : f32 to vector<64x128xf32>
    %25 = arith.maximumf %23, %24 : vector<64x128xf32>
    %c1 = arith.constant 1 : index
    %c0_13 = arith.constant 0 : index
    %c0_14 = arith.constant 0 : index
    %26 = vector.load %arg3[%c1, %c0_13, %c0_14] : memref<3x128x128xf32, #tpu.memory_space<vmem>>, vector<1x128x128xf32>
    %27 = vector.shape_cast %26 : vector<1x128x128xf32> to vector<128x128xf32>
    %cst_15 = arith.constant dense<0.000000e+00> : vector<64x128xf32>
    %28 = tpu.matmul %25, %27, %cst_15 {dimension_numbers = #tpu.dot_dimension_numbers<[1], [0], [0], [1], [0, 0, 1, 1], [], []>} : vector<64x128xf32>, vector<128x128xf32>, vector<64x128xf32> -> vector<64x128xf32>
    %c1_16 = arith.constant 1 : index
    %c0_17 = arith.constant 0 : index
    %c0_18 = arith.constant 0 : index
    %29 = vector.load %arg4[%c1_16, %c0_17, %c0_18] : memref<3x1x128xf32, #tpu.memory_space<vmem>>, vector<1x1x128xf32>
    %30 = vector.shape_cast %29 : vector<1x1x128xf32> to vector<1x128xf32>
    %31 = vector.broadcast %30 : vector<1x128xf32> to vector<64x128xf32>
    %32 = arith.addf %28, %31 : vector<64x128xf32>
    %cst_19 = arith.constant dense<0.000000e+00> : vector<64xf32>
    %33 = vector.multi_reduction <add>, %32, %cst_19 [1] : vector<64x128xf32> to vector<64xf32>
    %34 = vector.shape_cast %33 : vector<64xf32> to vector<64x1xf32>
    %cst_20 = arith.constant 1.280000e+02 : f32
    %35 = vector.broadcast %cst_20 : f32 to vector<64x1xf32>
    %36 = arith.divf %34, %35 : vector<64x1xf32>
    %37 = vector.broadcast %36 : vector<64x1xf32> to vector<64x128xf32>
    %38 = arith.subf %32, %37 : vector<64x128xf32>
    %39 = arith.mulf %38, %38 : vector<64x128xf32>
    %cst_21 = arith.constant dense<0.000000e+00> : vector<64xf32>
    %40 = vector.multi_reduction <add>, %39, %cst_21 [1] : vector<64x128xf32> to vector<64xf32>
    %41 = vector.shape_cast %40 : vector<64xf32> to vector<64x1xf32>
    %cst_22 = arith.constant 1.280000e+02 : f32
    %42 = vector.broadcast %cst_22 : f32 to vector<64x1xf32>
    %43 = arith.divf %41, %42 : vector<64x1xf32>
    %cst_23 = arith.constant 9.99999974E-6 : f32
    %44 = vector.broadcast %cst_23 : f32 to vector<64x1xf32>
    %45 = arith.addf %43, %44 : vector<64x1xf32>
    %46 = math.rsqrt %45 : vector<64x1xf32>
    %47 = vector.broadcast %46 : vector<64x1xf32> to vector<64x128xf32>
    %48 = arith.mulf %38, %47 : vector<64x128xf32>
    %cst_24 = arith.constant 0.000000e+00 : f32
    %49 = vector.broadcast %cst_24 : f32 to vector<64x128xf32>
    %50 = arith.maximumf %48, %49 : vector<64x128xf32>
    %c2 = arith.constant 2 : index
    %c0_25 = arith.constant 0 : index
    %c0_26 = arith.constant 0 : index
    %51 = vector.load %arg3[%c2, %c0_25, %c0_26] : memref<3x128x128xf32, #tpu.memory_space<vmem>>, vector<1x128x128xf32>
    %52 = vector.shape_cast %51 : vector<1x128x128xf32> to vector<128x128xf32>
    %cst_27 = arith.constant dense<0.000000e+00> : vector<64x128xf32>
    %53 = tpu.matmul %50, %52, %cst_27 {dimension_numbers = #tpu.dot_dimension_numbers<[1], [0], [0], [1], [0, 0, 1, 1], [], []>} : vector<64x128xf32>, vector<128x128xf32>, vector<64x128xf32> -> vector<64x128xf32>
    %c2_28 = arith.constant 2 : index
    %c0_29 = arith.constant 0 : index
    %c0_30 = arith.constant 0 : index
    %54 = vector.load %arg4[%c2_28, %c0_29, %c0_30] : memref<3x1x128xf32, #tpu.memory_space<vmem>>, vector<1x1x128xf32>
    %55 = vector.shape_cast %54 : vector<1x1x128xf32> to vector<1x128xf32>
    %56 = vector.broadcast %55 : vector<1x128xf32> to vector<64x128xf32>
    %57 = arith.addf %53, %56 : vector<64x128xf32>
    %cst_31 = arith.constant dense<0.000000e+00> : vector<64xf32>
    %58 = vector.multi_reduction <add>, %57, %cst_31 [1] : vector<64x128xf32> to vector<64xf32>
    %59 = vector.shape_cast %58 : vector<64xf32> to vector<64x1xf32>
    %cst_32 = arith.constant 1.280000e+02 : f32
    %60 = vector.broadcast %cst_32 : f32 to vector<64x1xf32>
    %61 = arith.divf %59, %60 : vector<64x1xf32>
    %62 = vector.broadcast %61 : vector<64x1xf32> to vector<64x128xf32>
    %63 = arith.subf %57, %62 : vector<64x128xf32>
    %64 = arith.mulf %63, %63 : vector<64x128xf32>
    %cst_33 = arith.constant dense<0.000000e+00> : vector<64xf32>
    %65 = vector.multi_reduction <add>, %64, %cst_33 [1] : vector<64x128xf32> to vector<64xf32>
    %66 = vector.shape_cast %65 : vector<64xf32> to vector<64x1xf32>
    %cst_34 = arith.constant 1.280000e+02 : f32
    %67 = vector.broadcast %cst_34 : f32 to vector<64x1xf32>
    %68 = arith.divf %66, %67 : vector<64x1xf32>
    %cst_35 = arith.constant 9.99999974E-6 : f32
    %69 = vector.broadcast %cst_35 : f32 to vector<64x1xf32>
    %70 = arith.addf %68, %69 : vector<64x1xf32>
    %71 = math.rsqrt %70 : vector<64x1xf32>
    %72 = vector.broadcast %71 : vector<64x1xf32> to vector<64x128xf32>
    %73 = arith.mulf %63, %72 : vector<64x128xf32>
    %cst_36 = arith.constant 0.000000e+00 : f32
    %74 = vector.broadcast %cst_36 : f32 to vector<64x128xf32>
    %75 = arith.maximumf %73, %74 : vector<64x128xf32>
    %c0_37 = arith.constant 0 : index
    %c0_38 = arith.constant 0 : index
    %76 = vector.load %arg5[%c0_37, %c0_38] : memref<64x128xf32, #tpu.memory_space<vmem>>, vector<64x128xf32>
    tpu.vector_store %arg5[%c0_37, %c0_38], %75 {strides = array<i32>} : memref<64x128xf32, #tpu.memory_space<vmem>>, vector<64x128xf32>,
    return
  }
  func.func @transform_0(%arg0: i32, %arg1: memref<1xi32, #tpu.memory_space<smem>>) -> (i32, i32) {
    %c0_i32 = arith.constant 0 : i32
    %c0_i32_0 = arith.constant 0 : i32
    return %arg0, %c0_i32 : i32, i32
  }
  func.func @transform_1(%arg0: i32, %arg1: memref<1xi32, #tpu.memory_space<smem>>) -> (i32, i32, i32) {
    %c0_i32 = arith.constant 0 : i32
    %c0_i32_0 = arith.constant 0 : i32
    %c0_i32_1 = arith.constant 0 : i32
    %c0_i32_2 = arith.constant 0 : i32
    return %c0_i32, %c0_i32_0, %c0_i32_1 : i32, i32, i32
  }
  func.func @transform_2(%arg0: i32, %arg1: memref<1xi32, #tpu.memory_space<smem>>) -> (i32, i32, i32) {
    %c0_i32 = arith.constant 0 : i32
    %c0_i32_0 = arith.constant 0 : i32
    %c0_i32_1 = arith.constant 0 : i32
    %c0_i32_2 = arith.constant 0 : i32
    return %c0_i32, %c0_i32_0, %c0_i32_1 : i32, i32, i32
  }
  func.func @transform_3(%arg0: i32, %arg1: memref<1xi32, #tpu.memory_space<smem>>) -> (i32, i32) {
    %c0_i32 = arith.constant 0 : i32
    %c0_i32_0 = arith.constant 0 : i32
    return %arg0, %c0_i32 : i32, i32
  }
}

</mosaic_0001>

<bundles_post_ra>
// kernel: tpu_custom_call.1
= control target key start
LH: loop header
LB: loop body
LE: loop exit
PB: predicated region body
PF: predicated region fallthrough
CT: control target
= control target key end

     0   :  { %10 = vsyncpa [#allocation5], 0  ;;  %s1293_s0 = inlined_call_operand.<no memory space> [shape: s32[1], index: 0, kind: input, shape index: {}]   ;;  %s1294_s1 = inlined_call_operand.hbm [shape: f32[64,128], index: 1, kind: input, shape index: {}]   ;;  %s1295_s2 = inlined_call_operand.hbm [shape: f32[3,128,128], index: 2, kind: input, shape index: {}]   ;;  %s1296_s3 = inlined_call_operand.vmem [shape: f32[3,1,128], index: 3, kind: input, shape index: {}]   ;;  %s1297_s4 = inlined_call_operand.hbm [shape: f32[64,128], index: 4, kind: output, shape index: {}]  }
   0x1   :  { %11 = vsyncpa [#allocation8], 0 }
   0x2   :  { %12 = vsyncpa [#allocation6], 0  ;;  %s1116_s15 = smov [#allocation4]  }
   0x3   :  { %s18_s16 = sshll.u32 %s1116_s15, 4  ;;  %s19_s16 = int_to_ptr.vmem [resolvable:$true] %s18_s16 }
   0x4   :  { %s1058_s17 = scalar_lea.vmem %s19_s16, 1024  ;;  %p1063_p1 = scmp.lt.s32.totalorder %s19_s16, %s19_s16 }
   0x5   :  { %p1059_p0 = scmp.ne.s32.totalorder %s19_s16, %s1058_s17  ;;  %p1064_p2 = scmp.lt.s32.totalorder %s1058_s17, %s1058_s17 }
   0x7   :  { %p1065_p3 = por %p1064_p2, %p1063_p1 }
   0x9   :  { %p1066_p4 = pnand %p1065_p3, %p1059_p0 }
   0xb   :  { %1069 = shalt.err (!%p1066_p4)
}
   0xc   :  { %s1117_s0 = smov 128   ;;  %s1118_s18 = smov 8  }
   0xd   :  { %24 = dma.hbm_to_vmem [thread:$0]  %s1294_s1, 1024, %s19_s16, [#allocation5], %s1117_s0, %s1117_s0, %s1118_s18  }
   0xe   :  { %s1119_s21 = smov [#allocation7]  }
   0xf   :  { %s30_s22 = sshll.u32 %s1119_s21, 4  ;;  %s31_s22 = int_to_ptr.vmem [resolvable:$true] %s30_s22 }
  0x10   :  { %s1078_s23 = scalar_lea.vmem %s31_s22, 6144  ;;  %p1083_p6 = scmp.lt.s32.totalorder %s31_s22, %s31_s22 }
  0x11   :  { %p1079_p5 = scmp.ne.s32.totalorder %s31_s22, %s1078_s23  ;;  %p1084_p7 = scmp.lt.s32.totalorder %s1078_s23, %s1078_s23 }
  0x13   :  { %p1085_p8 = por %p1084_p7, %p1083_p6 }
  0x15   :  { %p1086_p9 = pnand %p1085_p8, %p1079_p5 }
  0x17   :  { %1089 = shalt.err (!%p1086_p9)
}
  0x18   :  { %36 = dma.hbm_to_vmem [thread:$0]  %s1295_s2, 6144, %s31_s22, [#allocation8], %s1117_s0, %s1117_s0, %s1118_s18  }
  0x19   :  { %1110 = dma.done.wait [#allocation5], 1024  }
  0x1a   :  { %1111 = vsyncadd [#allocation5], 4294966272 }
  0x1b   :  { %1112 = dma.done.wait [#allocation8], 6144  }
  0x1c   :  { %1113 = vsyncadd [#allocation8], 4294961152  ;;  %v68_v0 = vld [vmem:[#allocation7 + $0x78] sm:$0xff]  ;;  %v67_v1 = vld [vmem:[#allocation7 + $0x70] sm:$0xff] }
  0x1d   :  { %833 = vmatprep.subr.mxu0 %v68_v0  ;;  %v66_v2 = vld [vmem:[#allocation7 + $0x68] sm:$0xff]  ;;  %v65_v3 = vld [vmem:[#allocation7 + $0x60] sm:$0xff]  ;;  %v64_v5 = vld [vmem:[#allocation7 + $0x58] sm:$0xff] }
  0x1e   :  { %834 = vmatpush3.msra.mxu0 %v68_v0  ;;  %v45_v4 = vld [vmem:[#allocation4] sm:$0xff]  ;;  %v63_v6 = vld [vmem:[#allocation7 + $0x50] sm:$0xff]  ;;  %v62_v7 = vld [vmem:[#allocation7 + $0x48] sm:$0xff] }
  0x1f   :  { %835 = vmatprep.subr.mxu0 %v67_v1  ;;  %865 = vmatprep.mubr.f32.mxu0 %v45_v4  ;;  %v61_v8 = vld [vmem:[#allocation7 + $0x40] sm:$0xff]  ;;  %v60_v9 = vld [vmem:[#allocation7 + $0x38] sm:$0xff]  ;;  %v59_v10 = vld [vmem:[#allocation7 + $0x30] sm:$0xff] }
  0x20   :  { %836 = vmatpush3.msra.mxu0 %v67_v1  ;;  %v58_v11 = vld [vmem:[#allocation7 + $0x28] sm:$0xff]  ;;  %v57_v12 = vld [vmem:[#allocation7 + $0x20] sm:$0xff]  ;;  %v56_v13 = vld [vmem:[#allocation7 + $0x18] sm:$0xff] }
  0x21   :  { %837 = vmatprep.subr.mxu0 %v66_v2  ;;  %v55_v14 = vld [vmem:[#allocation7 + $0x10] sm:$0xff]  ;;  %v54_v15 = vld [vmem:[#allocation7 + $0x8] sm:$0xff]  ;;  %v53_v16 = vld [vmem:[#allocation7] sm:$0xff] }
  0x22   :  { %838 = vmatpush3.msra.mxu0 %v66_v2  ;;  %v46_v17 = vld [vmem:[#allocation4 + $0x8] sm:$0xff]  ;;  %v47_v18 = vld [vmem:[#allocation4 + $0x10] sm:$0xff]  ;;  %v48_v19 = vld [vmem:[#allocation4 + $0x18] sm:$0xff] }
  0x23   :  { %839 = vmatprep.subr.mxu0 %v65_v3  ;;  %v49_v20 = vld [vmem:[#allocation4 + $0x20] sm:$0xff]  ;;  %v50_v21 = vld [vmem:[#allocation4 + $0x28] sm:$0xff]  ;;  %v51_v22 = vld [vmem:[#allocation4 + $0x30] sm:$0xff] }
  0x24   :  { %840 = vmatpush3.msra.mxu0 %v65_v3  ;;  %v52_v23 = vld [vmem:[#allocation4 + $0x38] sm:$0xff]  ;;  %v756_v25 = vld [vmem:[%s1296_s3] ss:$0 sm:$0xff]  ;;  %v293_v42 = vld [vmem:[#allocation7 + $0xf0] sm:$0xff] }
  0x25   :  { %841 = vmatprep.subr.mxu0 %v64_v5  ;;  %v294_v41 = vld [vmem:[#allocation7 + $0xf8] sm:$0xff]  ;;  %v292_v43 = vld [vmem:[#allocation7 + $0xe8] sm:$0xff] }
  0x26   :  { %842 = vmatpush3.msra.mxu0 %v64_v5  ;;  %877 = vmatprep.subr.mxu1 %v294_v41 }
  0x27   :  { %843 = vmatprep.subr.mxu0 %v63_v6  ;;  %878 = vmatpush3.msra.mxu1 %v294_v41 }
  0x28   :  { %844 = vmatpush3.msra.mxu0 %v63_v6  ;;  %879 = vmatprep.subr.mxu1 %v293_v42 }
  0x29   :  { %845 = vmatprep.subr.mxu0 %v62_v7  ;;  %880 = vmatpush3.msra.mxu1 %v293_v42 }
  0x2a   :  { %846 = vmatpush3.msra.mxu0 %v62_v7  ;;  %881 = vmatprep.subr.mxu1 %v292_v43  ;;  %v291_v7 = vld [vmem:[#allocation7 + $0xe0] sm:$0xff] }
  0x2b   :  { %847 = vmatprep.subr.mxu0 %v61_v8  ;;  %882 = vmatpush3.msra.mxu1 %v292_v43 }
  0x2c   :  { %848 = vmatpush3.msra.mxu0 %v61_v8  ;;  %883 = vmatprep.subr.mxu1 %v291_v7 }
  0x2d   :  { %849 = vmatprep.subr.mxu0 %v60_v9  ;;  %884 = vmatpush3.msra.mxu1 %v291_v7 }
  0x2e   :  { %850 = vmatpush3.msra.mxu0 %v60_v9 }
  0x2f   :  { %851 = vmatprep.subr.mxu0 %v59_v10 }
  0x30   :  { %852 = vmatpush3.msra.mxu0 %v59_v10 }
  0x31   :  { %853 = vmatprep.subr.mxu0 %v58_v11 }
  0x32   :  { %854 = vmatpush3.msra.mxu0 %v58_v11  ;;  %v290_v11 = vld [vmem:[#allocation7 + $0xd8] sm:$0xff] }
  0x33   :  { %855 = vmatprep.subr.mxu0 %v57_v12  ;;  %885 = vmatprep.subr.mxu1 %v290_v11 }
  0x34   :  { %856 = vmatpush3.msra.mxu0 %v57_v12  ;;  %886 = vmatpush3.msra.mxu1 %v290_v11 }
  0x35   :  { %857 = vmatprep.subr.mxu0 %v56_v13 }
  0x36   :  { %858 = vmatpush3.msra.mxu0 %v56_v13 }
  0x37   :  { %859 = vmatprep.subr.mxu0 %v55_v14 }
  0x38   :  { %860 = vmatpush3.msra.mxu0 %v55_v14  ;;  %v289_v14 = vld [vmem:[#allocation7 + $0xd0] sm:$0xff] }
  0x39   :  { %861 = vmatprep.subr.mxu0 %v54_v15  ;;  %887 = vmatprep.subr.mxu1 %v289_v14 }
  0x3a   :  { %862 = vmatpush3.msra.mxu0 %v54_v15  ;;  %888 = vmatpush3.msra.mxu1 %v289_v14  ;;  %v288_v15 = vld [vmem:[#allocation7 + $0xc8] sm:$0xff] }
  0x3b   :  { %863 = vmatprep.subr.mxu0 %v53_v16  ;;  %889 = vmatprep.subr.mxu1 %v288_v15 }
  0x3c   :  { %864 = vmatpush3.msra.mxu0 %v53_v16  ;;  %890 = vmatpush3.msra.mxu1 %v288_v15  ;;  %v287_v16 = vld [vmem:[#allocation7 + $0xc0] sm:$0xff] }
  0x3d   :  { %866 = vmatmul.mubr.f32.vlgmr.msra.gmra.mxu0 %v46_v17  ;;  %891 = vmatprep.subr.mxu1 %v287_v16  ;;  %v286_v17 = vld [vmem:[#allocation7 + $0xb8] sm:$0xff] }
  0x3e   :  { %868 = vmatprep.mubr.f32.mxu0 %v47_v18  ;;  %892 = vmatpush3.msra.mxu1 %v287_v16  ;;  %v285_v18 = vld [vmem:[#allocation7 + $0xb0] sm:$0xff] }
  0x3f   :  { %893 = vmatprep.subr.mxu1 %v286_v17 }
  0x40   :  { %894 = vmatpush3.msra.mxu1 %v286_v17 }
  0x41   :  { %869 = vmatmul.mubr.f32.gmra.mxu0 %v48_v19  ;;  %895 = vmatprep.subr.mxu1 %v285_v18  ;;  %v284_v19 = vld [vmem:[#allocation7 + $0xa8] sm:$0xff] }
  0x42   :  { %871 = vmatprep.mubr.f32.mxu0 %v49_v20  ;;  %896 = vmatpush3.msra.mxu1 %v285_v18  ;;  %v283_v20 = vld [vmem:[#allocation7 + $0xa0] sm:$0xff] }
  0x43   :  { %897 = vmatprep.subr.mxu1 %v284_v19 }
  0x44   :  { %898 = vmatpush3.msra.mxu1 %v284_v19 }
  0x45   :  { %872 = vmatmul.mubr.f32.gmra.mxu0 %v50_v21  ;;  %899 = vmatprep.subr.mxu1 %v283_v20  ;;  %v282_v21 = vld [vmem:[#allocation7 + $0x98] sm:$0xff] }
  0x46   :  { %874 = vmatprep.mubr.f32.mxu0 %v51_v22  ;;  %900 = vmatpush3.msra.mxu1 %v283_v20  ;;  %v281_v22 = vld [vmem:[#allocation7 + $0x90] sm:$0xff] }
  0x47   :  { %901 = vmatprep.subr.mxu1 %v282_v21 }
  0x48   :  { %902 = vmatpush3.msra.mxu1 %v282_v21 }
  0x49   :  { %875 = vmatmul.mubr.f32.gmra.mxu0 %v52_v23  ;;  %v280_v23 = vld [vmem:[#allocation7 + $0x88] sm:$0xff]  ;;  %903 = vmatprep.subr.mxu1 %v281_v22 }
  0x4a   :  { %904 = vmatpush3.msra.mxu1 %v281_v22 }
  0x4b   :  { %905 = vmatprep.subr.mxu1 %v280_v23 }
  0x4c   :  { %906 = vmatpush3.msra.mxu1 %v280_v23 }
  0xfd   :  { %v867_v24 = vpop.f32.mrf.mxu0 }
  0xfe   :  { %v148_v30 = vadd.f32 %v867_v24, %v756_v25  ;;  %v279_v24 = vld [vmem:[#allocation7 + $0x80] sm:$0xff] }
  0xff   :  { %v142_v26 = vpop.f32.mrf.mxu0  ;;  %907 = vmatprep.subr.mxu1 %v279_v24 }
 0x100   :  { %v143_v27 = vadd.f32 %v756_v25, %v142_v26  ;;  %908 = vmatpush3.msra.mxu1 %v279_v24 }
 0x101   :  { %v870_v28 = vpop.f32.mrf.mxu0 }
 0x102   :  { %181 = vadd.xlane.f32.xlu0 %v143_v27  ;;  %v158_v34 = vadd.f32 %v870_v28, %v756_v25 }
 0x103   :  { %v152_v29 = vpop.f32.mrf.mxu0 }
 0x104   :  { %v153_v31 = vadd.f32 %v756_v25, %v152_v29 }
 0x105   :  { %v873_v32 = vpop.f32.mrf.mxu0 }
 0x106   :  { %185 = vadd.xlane.f32.xlu1 %v153_v31  ;;  %183 = vadd.xlane.f32.xlu0 %v148_v30  ;;  %v168_v38 = vadd.f32 %v873_v32, %v756_v25 }
 0x107   :  { %v162_v33 = vpop.f32.mrf.mxu0 }
 0x108   :  { %v163_v35 = vadd.f32 %v756_v25, %v162_v33 }
 0x109   :  { %v876_v36 = vpop.f32.mrf.mxu0 }
 0x10a   :  { %187 = vadd.xlane.f32.xlu1 %v158_v34  ;;  %189 = vadd.xlane.f32.xlu0 %v163_v35  ;;  %v178_v40 = vadd.f32 %v876_v36, %v756_v25 }
 0x10b   :  { %v172_v37 = vpop.f32.mrf.mxu0 }
 0x10c   :  { %v173_v39 = vadd.f32 %v756_v25, %v172_v37 }
 0x10e   :  { %191 = vadd.xlane.f32.xlu1 %v168_v38  ;;  %193 = vadd.xlane.f32.xlu0 %v173_v39 }
 0x112   :  { %195 = vadd.xlane.f32.xlu1 %v178_v40 }
 0x18b   :  { %v182_v44 = vpop.xlane.xlu0 %181 }
 0x18c   :  { %v198_v45 = vmul.f32 0.0078125, %v182_v44 }
 0x18e   :  { %v1161_v46 = vsub.f32 %v143_v27, %v198_v45 }
 0x18f   :  { %v186_v47 = vpop.xlane.xlu1 %185  ;;  %v184_v48 = vpop.xlane.xlu0 %183 }
 0x190   :  { %v200_v49 = vmul.f32 0.0078125, %v186_v47  ;;  %v199_v50 = vmul.f32 0.0078125, %v184_v48  ;;  %v214_v51 = vmul.f32 %v1161_v46, %v1161_v46 }
 0x192   :  { %v1165_v52 = vsub.f32 %v153_v31, %v200_v49  ;;  %v1167_v53 = vsub.f32 %v148_v30, %v199_v50  ;;  %222 = vadd.xlane.f32.xlu0 %v214_v51 }
 0x193   :  { %v188_v54 = vpop.xlane.xlu1 %187  ;;  %v190_v55 = vpop.xlane.xlu0 %189 }
 0x194   :  { %v201_v56 = vmul.f32 0.0078125, %v188_v54  ;;  %v202_v57 = vmul.f32 0.0078125, %v190_v55  ;;  %v216_v58 = vmul.f32 %v1165_v52, %v1165_v52  ;;  %v215_v59 = vmul.f32 %v1167_v53, %v1167_v53 }
 0x196   :  { %v1173_v60 = vsub.f32 %v158_v34, %v201_v56  ;;  %v1175_v61 = vsub.f32 %v163_v35, %v202_v57  ;;  %226 = vadd.xlane.f32.xlu0 %v216_v58  ;;  %224 = vadd.xlane.f32.xlu1 %v215_v59 }
 0x197   :  { %v192_v62 = vpop.xlane.xlu1 %191  ;;  %v194_v63 = vpop.xlane.xlu0 %193 }
 0x198   :  { %v203_v0 = vmul.f32 0.0078125, %v192_v62  ;;  %v204_v1 = vmul.f32 0.0078125, %v194_v63  ;;  %v217_v2 = vmul.f32 %v1173_v60, %v1173_v60  ;;  %v218_v3 = vmul.f32 %v1175_v61, %v1175_v61 }
 0x19a   :  { %v1181_v4 = vsub.f32 %v168_v38, %v203_v0  ;;  %v1183_v5 = vsub.f32 %v173_v39, %v204_v1  ;;  %228 = vadd.xlane.f32.xlu1 %v217_v2  ;;  %230 = vadd.xlane.f32.xlu0 %v218_v3 }
 0x19b   :  { %v196_v6 = vpop.xlane.xlu1 %195 }
 0x19c   :  { %v205_v8 = vmul.f32 0.0078125, %v196_v6  ;;  %v219_v9 = vmul.f32 %v1181_v4, %v1181_v4  ;;  %v220_v10 = vmul.f32 %v1183_v5, %v1183_v5 }
 0x19e   :  { %v1189_v12 = vsub.f32 %v178_v40, %v205_v8  ;;  %232 = vadd.xlane.f32.xlu1 %v219_v9  ;;  %234 = vadd.xlane.f32.xlu0 %v220_v10 }
 0x1a0   :  { %v221_v13 = vmul.f32 %v1189_v12, %v1189_v12 }
 0x1a2   :  { %236 = vadd.xlane.f32.xlu1 %v221_v13 }
 0x21b   :  { %v223_v25 = vpop.xlane.xlu0 %222 }
 0x21c   :  { %v238_v26 = vmul.f32 0.0078125, %v223_v25 }
 0x21e   :  { %v246_v27 = vadd.f32 1e-05, %v238_v26  ;;  %v520_v26 = vld [vmem:[#allocation7 + $0x178] sm:$0xff] }
 0x21f   :  { %v225_v28 = vpop.xlane.xlu1 %224  ;;  %v227_v29 = vpop.xlane.xlu0 %226  ;;  %921 = vmatprep.subr.mxu0 %v520_v26  ;;  %965 = vmatprep.subr.mxu1 %v520_v26 }
 0x220   :  { %1002 = vrsqrt.f32 %v246_v27  ;;  %v239_v30 = vmul.f32 0.0078125, %v225_v28  ;;  %v240_v31 = vmul.f32 0.0078125, %v227_v29  ;;  %v519_v27 = vld [vmem:[#allocation7 + $0x170] sm:$0xff]  ;;  %922 = vmatpush3.msra.mxu0 %v520_v26  ;;  %v518_v28 = vld [vmem:[#allocation7 + $0x168] sm:$0xff] }
 0x221   :  { %923 = vmatprep.subr.mxu0 %v519_v27 }
 0x222   :  { %v247_v32 = vadd.f32 1e-05, %v239_v30  ;;  %v248_v33 = vadd.f32 1e-05, %v240_v31  ;;  %924 = vmatpush3.msra.mxu0 %v519_v27 }
 0x223   :  { %v229_v34 = vpop.xlane.xlu1 %228  ;;  %v231_v35 = vpop.xlane.xlu0 %230  ;;  %925 = vmatprep.subr.mxu0 %v518_v28 }
 0x224   :  { %1004 = vrsqrt.f32 %v247_v32  ;;  %v241_v36 = vmul.f32 0.0078125, %v229_v34  ;;  %v242_v37 = vmul.f32 0.0078125, %v231_v35  ;;  %926 = vmatpush3.msra.mxu0 %v518_v28 }
 0x225   :  { %1006 = vrsqrt.f32 %v248_v33 }
 0x226   :  { %v249_v38 = vadd.f32 1e-05, %v241_v36  ;;  %v250_v39 = vadd.f32 1e-05, %v242_v37 }
 0x227   :  { %v233_v40 = vpop.xlane.xlu1 %232  ;;  %v235_v41 = vpop.xlane.xlu0 %234 }
 0x228   :  { %1008 = vrsqrt.f32 %v249_v38  ;;  %v243_v42 = vmul.f32 0.0078125, %v233_v40  ;;  %v244_v43 = vmul.f32 0.0078125, %v235_v41 }
 0x229   :  { %1010 = vrsqrt.f32 %v250_v39 }
 0x22a   :  { %v251_v44 = vadd.f32 1e-05, %v243_v42  ;;  %v252_v45 = vadd.f32 1e-05, %v244_v43 }
 0x22b   :  { %v237_v47 = vpop.xlane.xlu1 %236 }
 0x22c   :  { %1012 = vrsqrt.f32 %v251_v44  ;;  %v245_v48 = vmul.f32 0.0078125, %v237_v47 }
 0x22d   :  { %v1003_v49 = vpop.eup %1002  ;;  %1014 = vrsqrt.f32 %v252_v45 }
 0x22e   :  { %v253_v50 = vadd.f32 1e-05, %v245_v48  ;;  %v262_v51 = vmul.f32 %v1003_v49, %v1161_v46 }
 0x230   :  { %1016 = vrsqrt.f32 %v253_v50  ;;  %v270_v54 = vmax.f32 %v262_v51, 0.0 }
 0x231   :  { %v1005_v55 = vpop.eup %1004 }
 0x232   :  { %v1007_v56 = vpop.eup %1006  ;;  %909 = vmatprep.mubr.f32.mxu1 %v270_v54  ;;  %v263_v57 = vmul.f32 %v1005_v55, %v1167_v53 }
 0x233   :  { %v264_v58 = vmul.f32 %v1007_v56, %v1165_v52 }
 0x234   :  { %v271_v59 = vmax.f32 %v263_v57, 0.0 }
 0x235   :  { %v1009_v62 = vpop.eup %1008  ;;  %v272_v63 = vmax.f32 %v264_v58, 0.0  ;;  %v517_v58 = vld [vmem:[#allocation7 + $0x160] sm:$0xff] }
 0x236   :  { %v1011_v0 = vpop.eup %1010  ;;  %910 = vmatmul.mubr.f32.vlgmr.msra.gmra.mxu1 %v271_v59  ;;  %v265_v1 = vmul.f32 %v1009_v62, %v1173_v60  ;;  %927 = vmatprep.subr.mxu0 %v517_v58 }
 0x237   :  { %912 = vmatprep.mubr.f32.mxu1 %v272_v63  ;;  %v266_v2 = vmul.f32 %v1011_v0, %v1175_v61  ;;  %v758_v61 = vld [vmem:[%s1296_s3 + $0x1] ss:$0 sm:$0xff]  ;;  %981 = vmatpush3.msra.mxu1 %v520_v26  ;;  %v516_v63 = vld [vmem:[#allocation7 + $0x158] sm:$0xff] }
 0x238   :  { %v273_v46 = vmax.f32 %v265_v1, 0.0  ;;  %966 = vmatprep.subr.mxu1 %v519_v27  ;;  %928 = vmatpush3.msra.mxu0 %v517_v58 }
 0x239   :  { %v1013_v3 = vpop.eup %1012  ;;  %v274_v6 = vmax.f32 %v266_v2, 0.0  ;;  %982 = vmatpush3.msra.mxu1 %v519_v27  ;;  %929 = vmatprep.subr.mxu0 %v516_v63  ;;  %v515_v2 = vld [vmem:[#allocation7 + $0x150] sm:$0xff] }
 0x23a   :  { %v1015_v7 = vpop.eup %1014  ;;  %913 = vmatmul.mubr.f32.gmra.mxu1 %v273_v46  ;;  %v267_v8 = vmul.f32 %v1013_v3, %v1181_v4  ;;  %967 = vmatprep.subr.mxu1 %v518_v28  ;;  %v514_v3 = vld [vmem:[#allocation7 + $0x148] sm:$0xff] }
 0x23b   :  { %915 = vmatprep.mubr.f32.mxu1 %v274_v6  ;;  %v268_v52 = vmul.f32 %v1015_v7, %v1183_v5  ;;  %983 = vmatpush3.msra.mxu1 %v518_v28  ;;  %v513_v7 = vld [vmem:[#allocation7 + $0x140] sm:$0xff] }
 0x23c   :  { %v275_v53 = vmax.f32 %v267_v8, 0.0  ;;  %968 = vmatprep.subr.mxu1 %v517_v58  ;;  %930 = vmatpush3.msra.mxu0 %v516_v63  ;;  %v512_v8 = vld [vmem:[#allocation7 + $0x138] sm:$0xff] }
 0x23d   :  { %v1017_v9 = vpop.eup %1016  ;;  %v276_v10 = vmax.f32 %v268_v52, 0.0  ;;  %984 = vmatpush3.msra.mxu1 %v517_v58  ;;  %931 = vmatprep.subr.mxu0 %v515_v2  ;;  %v511_v52 = vld [vmem:[#allocation7 + $0x130] sm:$0xff] }
 0x23e   :  { %916 = vmatmul.mubr.f32.gmra.mxu1 %v275_v53  ;;  %v269_v11 = vmul.f32 %v1017_v9, %v1189_v12  ;;  %969 = vmatprep.subr.mxu1 %v516_v63  ;;  %v510_v53 = vld [vmem:[#allocation7 + $0x128] sm:$0xff]  ;;  %v509_v9 = vld [vmem:[#allocation7 + $0x120] sm:$0xff] }
 0x23f   :  { %918 = vmatprep.mubr.f32.mxu1 %v276_v10  ;;  %985 = vmatpush3.msra.mxu1 %v516_v63  ;;  %v508_v10 = vld [vmem:[#allocation7 + $0x118] sm:$0xff] }
 0x240   :  { %v277_v60 = vmax.f32 %v269_v11, 0.0  ;;  %932 = vmatpush3.msra.mxu0 %v515_v2  ;;  %970 = vmatprep.subr.mxu1 %v515_v2  ;;  %v507_v11 = vld [vmem:[#allocation7 + $0x110] sm:$0xff] }
 0x241   :  { %933 = vmatprep.subr.mxu0 %v514_v3  ;;  %986 = vmatpush3.msra.mxu1 %v515_v2 }
 0x242   :  { %919 = vmatmul.mubr.f32.gmra.mxu1 %v277_v60  ;;  %934 = vmatpush3.msra.mxu0 %v514_v3  ;;  %v506_v60 = vld [vmem:[#allocation7 + $0x108] sm:$0xff] }
 0x243   :  { %935 = vmatprep.subr.mxu0 %v513_v7  ;;  %971 = vmatprep.subr.mxu1 %v514_v3 }
 0x244   :  { %936 = vmatpush3.msra.mxu0 %v513_v7  ;;  %987 = vmatpush3.msra.mxu1 %v514_v3 }
 0x245   :  { %937 = vmatprep.subr.mxu0 %v512_v8  ;;  %972 = vmatprep.subr.mxu1 %v513_v7 }
 0x246   :  { %938 = vmatpush3.msra.mxu0 %v512_v8  ;;  %988 = vmatpush3.msra.mxu1 %v513_v7 }
 0x247   :  { %939 = vmatprep.subr.mxu0 %v511_v52  ;;  %973 = vmatprep.subr.mxu1 %v512_v8 }
 0x248   :  { %940 = vmatpush3.msra.mxu0 %v511_v52  ;;  %989 = vmatpush3.msra.mxu1 %v512_v8 }
 0x249   :  { %941 = vmatprep.subr.mxu0 %v510_v53  ;;  %974 = vmatprep.subr.mxu1 %v511_v52 }
 0x24a   :  { %942 = vmatpush3.msra.mxu0 %v510_v53  ;;  %990 = vmatpush3.msra.mxu1 %v511_v52 }
 0x24b   :  { %943 = vmatprep.subr.mxu0 %v509_v9  ;;  %975 = vmatprep.subr.mxu1 %v510_v53 }
 0x24c   :  { %944 = vmatpush3.msra.mxu0 %v509_v9  ;;  %991 = vmatpush3.msra.mxu1 %v510_v53 }
 0x24d   :  { %945 = vmatprep.subr.mxu0 %v508_v10  ;;  %976 = vmatprep.subr.mxu1 %v509_v9 }
 0x24e   :  { %946 = vmatpush3.msra.mxu0 %v508_v10  ;;  %992 = vmatpush3.msra.mxu1 %v509_v9 }
 0x24f   :  { %947 = vmatprep.subr.mxu0 %v507_v11  ;;  %977 = vmatprep.subr.mxu1 %v508_v10 }
 0x250   :  { %948 = vmatpush3.msra.mxu0 %v507_v11  ;;  %993 = vmatpush3.msra.mxu1 %v508_v10 }
 0x251   :  { %949 = vmatprep.subr.mxu0 %v506_v60  ;;  %978 = vmatprep.subr.mxu1 %v507_v11 }
 0x252   :  { %950 = vmatpush3.msra.mxu0 %v506_v60  ;;  %994 = vmatpush3.msra.mxu1 %v507_v11 }
 0x253   :  { %979 = vmatprep.subr.mxu1 %v506_v60 }
 0x254   :  { %995 = vmatpush3.msra.mxu1 %v506_v60 }
 0x2f6   :  { %v911_v13 = vpop.f32.mrf.mxu1 }
 0x2f7   :  { %v375_v14 = vadd.f32 %v911_v13, %v758_v61 }
 0x2f8   :  { %v369_v15 = vpop.f32.mrf.mxu1 }
 0x2f9   :  { %410 = vadd.xlane.f32.xlu0 %v375_v14  ;;  %v370_v16 = vadd.f32 %v758_v61, %v369_v15 }
 0x2fa   :  { %v914_v4 = vpop.f32.mrf.mxu1 }
 0x2fb   :  { %v385_v21 = vadd.f32 %v914_v4, %v758_v61 }
 0x2fc   :  { %v379_v5 = vpop.f32.mrf.mxu1 }
 0x2fd   :  { %408 = vadd.xlane.f32.xlu0 %v370_v16  ;;  %v380_v18 = vadd.f32 %v758_v61, %v379_v5 }
 0x2fe   :  { %v917_v17 = vpop.f32.mrf.mxu1 }
 0x2ff   :  { %v395_v19 = vadd.f32 %v917_v17, %v758_v61 }
 0x300   :  { %v389_v20 = vpop.f32.mrf.mxu1 }
 0x301   :  { %412 = vadd.xlane.f32.xlu0 %v380_v18  ;;  %418 = vadd.xlane.f32.xlu1 %v395_v19  ;;  %v390_v22 = vadd.f32 %v758_v61, %v389_v20 }
 0x302   :  { %v920_v12 = vpop.f32.mrf.mxu1 }
 0x303   :  { %v405_v25 = vadd.f32 %v920_v12, %v758_v61 }
 0x304   :  { %v399_v23 = vpop.f32.mrf.mxu1 }
 0x305   :  { %414 = vadd.xlane.f32.xlu0 %v385_v21  ;;  %416 = vadd.xlane.f32.xlu1 %v390_v22  ;;  %v400_v24 = vadd.f32 %v758_v61, %v399_v23  ;;  %v505_v61 = vld [vmem:[#allocation7 + $0x100] sm:$0xff] }
 0x306   :  { %951 = vmatprep.subr.mxu0 %v505_v61  ;;  %980 = vmatprep.subr.mxu1 %v505_v61 }
 0x307   :  { %952 = vmatpush3.msra.mxu0 %v505_v61  ;;  %996 = vmatpush3.msra.mxu1 %v505_v61 }
 0x309   :  { %420 = vadd.xlane.f32.xlu1 %v400_v24 }
 0x30d   :  { %422 = vadd.xlane.f32.xlu1 %v405_v25 }
 0x382   :  { %v411_v29 = vpop.xlane.xlu0 %410 }
 0x383   :  { %v425_v30 = vmul.f32 0.0078125, %v411_v29 }
 0x385   :  { %v1204_v31 = vsub.f32 %v375_v14, %v425_v30 }
 0x386   :  { %v409_v32 = vpop.xlane.xlu0 %408 }
 0x387   :  { %v424_v33 = vmul.f32 0.0078125, %v409_v32  ;;  %v441_v34 = vmul.f32 %v1204_v31, %v1204_v31 }
 0x389   :  { %v1208_v35 = vsub.f32 %v370_v16, %v424_v33  ;;  %450 = vadd.xlane.f32.xlu0 %v441_v34 }
 0x38a   :  { %v419_v36 = vpop.xlane.xlu1 %418  ;;  %v413_v37 = vpop.xlane.xlu0 %412 }
 0x38b   :  { %v429_v38 = vmul.f32 0.0078125, %v419_v36  ;;  %v426_v39 = vmul.f32 0.0078125, %v413_v37  ;;  %v440_v40 = vmul.f32 %v1208_v35, %v1208_v35 }
 0x38d   :  { %v1212_v41 = vsub.f32 %v395_v19, %v429_v38  ;;  %v1214_v42 = vsub.f32 %v380_v18, %v426_v39  ;;  %448 = vadd.xlane.f32.xlu0 %v440_v40 }
 0x38e   :  { %v417_v43 = vpop.xlane.xlu1 %416  ;;  %v415_v44 = vpop.xlane.xlu0 %414 }
 0x38f   :  { %v428_v45 = vmul.f32 0.0078125, %v417_v43  ;;  %v427_v47 = vmul.f32 0.0078125, %v415_v44  ;;  %v445_v48 = vmul.f32 %v1212_v41, %v1212_v41  ;;  %v442_v49 = vmul.f32 %v1214_v42, %v1214_v42 }
 0x391   :  { %v1220_v50 = vsub.f32 %v390_v22, %v428_v45  ;;  %v1222_v51 = vsub.f32 %v385_v21, %v427_v47  ;;  %458 = vadd.xlane.f32.xlu1 %v445_v48  ;;  %452 = vadd.xlane.f32.xlu0 %v442_v49 }
 0x392   :  { %v421_v54 = vpop.xlane.xlu1 %420 }
 0x393   :  { %v430_v55 = vmul.f32 0.0078125, %v421_v54  ;;  %v444_v56 = vmul.f32 %v1220_v50, %v1220_v50  ;;  %v443_v57 = vmul.f32 %v1222_v51, %v1222_v51 }
 0x395   :  { %v1228_v59 = vsub.f32 %v400_v24, %v430_v55  ;;  %456 = vadd.xlane.f32.xlu1 %v444_v56  ;;  %454 = vadd.xlane.f32.xlu0 %v443_v57 }
 0x396   :  { %v423_v62 = vpop.xlane.xlu1 %422 }
 0x397   :  { %v431_v0 = vmul.f32 0.0078125, %v423_v62  ;;  %v446_v1 = vmul.f32 %v1228_v59, %v1228_v59 }
 0x399   :  { %v1232_v46 = vsub.f32 %v405_v25, %v431_v0  ;;  %460 = vadd.xlane.f32.xlu1 %v446_v1 }
 0x39b   :  { %v447_v6 = vmul.f32 %v1232_v46, %v1232_v46 }
 0x39d   :  { %462 = vadd.xlane.f32.xlu1 %v447_v6 }
 0x412   :  { %v451_v13 = vpop.xlane.xlu0 %450 }
 0x413   :  { %v465_v14 = vmul.f32 0.0078125, %v451_v13 }
 0x415   :  { %v473_v15 = vadd.f32 1e-05, %v465_v14 }
 0x416   :  { %v449_v4 = vpop.xlane.xlu0 %448 }
 0x417   :  { %v464_v16 = vmul.f32 0.0078125, %v449_v4  ;;  %1018 = vrsqrt.f32 %v473_v15 }
 0x419   :  { %v472_v5 = vadd.f32 1e-05, %v464_v16 }
 0x41a   :  { %v459_v17 = vpop.xlane.xlu1 %458  ;;  %v453_v18 = vpop.xlane.xlu0 %452 }
 0x41b   :  { %1020 = vrsqrt.f32 %v472_v5  ;;  %v469_v19 = vmul.f32 0.0078125, %v459_v17  ;;  %v466_v20 = vmul.f32 0.0078125, %v453_v18 }
 0x41d   :  { %v477_v12 = vadd.f32 1e-05, %v469_v19  ;;  %v474_v21 = vadd.f32 1e-05, %v466_v20 }
 0x41e   :  { %v457_v22 = vpop.xlane.xlu1 %456  ;;  %v455_v23 = vpop.xlane.xlu0 %454 }
 0x41f   :  { %1022 = vrsqrt.f32 %v477_v12  ;;  %v468_v24 = vmul.f32 0.0078125, %v457_v22  ;;  %v467_v25 = vmul.f32 0.0078125, %v455_v23 }
 0x420   :  { %1024 = vrsqrt.f32 %v474_v21 }
 0x421   :  { %v476_v26 = vadd.f32 1e-05, %v468_v24  ;;  %v475_v27 = vadd.f32 1e-05, %v467_v25 }
 0x422   :  { %v461_v28 = vpop.xlane.xlu1 %460 }
 0x423   :  { %1026 = vrsqrt.f32 %v476_v26  ;;  %v470_v29 = vmul.f32 0.0078125, %v461_v28 }
 0x424   :  { %1028 = vrsqrt.f32 %v475_v27  ;;  %v1019_v30 = vpop.eup %1018 }
 0x425   :  { %v478_v32 = vadd.f32 1e-05, %v470_v29  ;;  %v489_v37 = vmul.f32 %v1019_v30, %v1204_v31 }
 0x426   :  { %v463_v33 = vpop.xlane.xlu1 %462 }
 0x427   :  { %1030 = vrsqrt.f32 %v478_v32  ;;  %v471_v34 = vmul.f32 0.0078125, %v463_v33  ;;  %v497_v44 = vmax.f32 %v489_v37, 0.0 }
 0x428   :  { %v1021_v36 = vpop.eup %1020 }
 0x429   :  { %v479_v38 = vadd.f32 1e-05, %v471_v34  ;;  %v488_v39 = vmul.f32 %v1021_v36, %v1208_v35 }
 0x42b   :  { %1032 = vrsqrt.f32 %v479_v38  ;;  %v496_v40 = vmax.f32 %v488_v39, 0.0 }
 0x42c   :  { %v1023_v43 = vpop.eup %1022 }
 0x42d   :  { %v1025_v45 = vpop.eup %1024  ;;  %953 = vmatprep.mubr.f32.mxu0 %v496_v40  ;;  %v493_v54 = vmul.f32 %v1023_v43, %v1212_v41 }
 0x42e   :  { %954 = vmatmul.mubr.f32.vlgmr.msra.gmra.mxu0 %v497_v44  ;;  %v490_v47 = vmul.f32 %v1025_v45, %v1214_v42 }
 0x42f   :  { %v501_v62 = vmax.f32 %v493_v54, 0.0 }
 0x430   :  { %v1027_v48 = vpop.eup %1026  ;;  %v498_v49 = vmax.f32 %v490_v47, 0.0 }
 0x431   :  { %v1029_v55 = vpop.eup %1028  ;;  %v492_v56 = vmul.f32 %v1027_v48, %v1220_v50  ;;  %v760_v50 = vld [vmem:[%s1296_s3 + $0x2] ss:$0 sm:$0xff]  ;;  %s1120_s3 = smov [#allocation9]  }
 0x432   :  { %956 = vmatprep.mubr.f32.mxu0 %v498_v49  ;;  %v491_v31 = vmul.f32 %v1029_v55, %v1222_v51  ;;  %s743_s30 = sshll.u32 %s1120_s3, 4  ;;  %s744_s30 = int_to_ptr.vmem [resolvable:$true] %s743_s30 }
 0x433   :  { %v500_v35 = vmax.f32 %v492_v56, 0.0  ;;  %s1090_s5 = scalar_lea.vmem %s744_s30, 1024  ;;  %p1095_p11 = scmp.lt.s32.totalorder %s744_s30, %s744_s30 }
 0x434   :  { %v1031_v57 = vpop.eup %1030  ;;  %v499_v58 = vmax.f32 %v491_v31, 0.0  ;;  %p1091_p10 = scmp.ne.s32.totalorder %s744_s30, %s1090_s5  ;;  %p1096_p12 = scmp.lt.s32.totalorder %s1090_s5, %s1090_s5 }
 0x435   :  { %959 = vmatprep.mubr.f32.mxu1 %v500_v35  ;;  %v494_v63 = vmul.f32 %v1031_v57, %v1228_v59 }
 0x436   :  { %957 = vmatmul.mubr.f32.gmra.mxu0 %v499_v58  ;;  %960 = vmatmul.mubr.f32.vlgmr.msra.gmra.mxu1 %v501_v62  ;;  %p1097_p13 = por %p1096_p12, %p1095_p11 }
 0x437   :  { %v502_v42 = vmax.f32 %v494_v63, 0.0 }
 0x438   :  { %v1033_v0 = vpop.eup %1032  ;;  %p1098_p0 = pnand %p1097_p13, %p1091_p10 }
 0x439   :  { %962 = vmatprep.mubr.f32.mxu1 %v502_v42  ;;  %v495_v41 = vmul.f32 %v1033_v0, %v1232_v46 }
 0x43b   :  { %v503_v1 = vmax.f32 %v495_v41, 0.0 }
 0x43d   :  { %963 = vmatmul.mubr.f32.gmra.mxu1 %v503_v1 }
 0x4ee   :  { %v955_v51 = vpop.f32.mrf.mxu0 }
 0x4ef   :  { %v601_v2 = vadd.f32 %v955_v51, %v760_v50 }
 0x4f0   :  { %v595_v3 = vpop.f32.mrf.mxu0 }
 0x4f1   :  { %v596_v6 = vadd.f32 %v760_v50, %v595_v3  ;;  %636 = vadd.xlane.f32.xlu1 %v601_v2 }
 0x4f3   :  { %634 = vadd.xlane.f32.xlu0 %v596_v6 }
 0x4f6   :  { %v958_v59 = vpop.f32.mrf.mxu0  ;;  %v961_v7 = vpop.f32.mrf.mxu1 }
 0x4f7   :  { %v611_v8 = vadd.f32 %v958_v59, %v760_v50  ;;  %v621_v46 = vadd.f32 %v961_v7, %v760_v50 }
 0x4f8   :  { %v605_v52 = vpop.f32.mrf.mxu0  ;;  %v615_v9 = vpop.f32.mrf.mxu1 }
 0x4f9   :  { %v606_v53 = vadd.f32 %v760_v50, %v605_v52  ;;  %640 = vadd.xlane.f32.xlu1 %v611_v8  ;;  %v616_v10 = vadd.f32 %v760_v50, %v615_v9 }
 0x4fb   :  { %638 = vadd.xlane.f32.xlu0 %v606_v53 }
 0x4fd   :  { %644 = vadd.xlane.f32.xlu1 %v621_v46  ;;  %v964_v11 = vpop.f32.mrf.mxu1 }
 0x4fe   :  { %v631_v60 = vadd.f32 %v964_v11, %v760_v50 }
 0x4ff   :  { %642 = vadd.xlane.f32.xlu0 %v616_v10  ;;  %v625_v61 = vpop.f32.mrf.mxu1 }
 0x500   :  { %v626_v13 = vadd.f32 %v760_v50, %v625_v61 }
 0x501   :  { %648 = vadd.xlane.f32.xlu1 %v631_v60 }
 0x503   :  { %646 = vadd.xlane.f32.xlu0 %v626_v13 }
 0x57a   :  { %v637_v14 = vpop.xlane.xlu1 %636 }
 0x57b   :  { %v651_v15 = vmul.f32 0.0078125, %v637_v14 }
 0x57c   :  { %v635_v4 = vpop.xlane.xlu0 %634 }
 0x57d   :  { %v1247_v16 = vsub.f32 %v601_v2, %v651_v15  ;;  %v650_v5 = vmul.f32 0.0078125, %v635_v4 }
 0x57f   :  { %v1249_v17 = vsub.f32 %v596_v6, %v650_v5  ;;  %v667_v18 = vmul.f32 %v1247_v16, %v1247_v16 }
 0x581   :  { %676 = vadd.xlane.f32.xlu1 %v667_v18  ;;  %v666_v19 = vmul.f32 %v1249_v17, %v1249_v17 }
 0x582   :  { %v641_v20 = vpop.xlane.xlu1 %640 }
 0x583   :  { %v653_v12 = vmul.f32 0.0078125, %v641_v20  ;;  %674 = vadd.xlane.f32.xlu0 %v666_v19 }
 0x584   :  { %v639_v21 = vpop.xlane.xlu0 %638 }
 0x585   :  { %v1255_v22 = vsub.f32 %v611_v8, %v653_v12  ;;  %v652_v23 = vmul.f32 0.0078125, %v639_v21 }
 0x586   :  { %v645_v24 = vpop.xlane.xlu1 %644 }
 0x587   :  { %v1257_v25 = vsub.f32 %v606_v53, %v652_v23  ;;  %v655_v26 = vmul.f32 0.0078125, %v645_v24  ;;  %v669_v27 = vmul.f32 %v1255_v22, %v1255_v22 }
 0x588   :  { %v643_v28 = vpop.xlane.xlu0 %642 }
 0x589   :  { %v1261_v29 = vsub.f32 %v621_v46, %v655_v26  ;;  %v654_v30 = vmul.f32 0.0078125, %v643_v28  ;;  %680 = vadd.xlane.f32.xlu1 %v669_v27  ;;  %v668_v32 = vmul.f32 %v1257_v25, %v1257_v25 }
 0x58a   :  { %v649_v33 = vpop.xlane.xlu1 %648 }
 0x58b   :  { %v1265_v34 = vsub.f32 %v616_v10, %v654_v30  ;;  %v657_v36 = vmul.f32 0.0078125, %v649_v33  ;;  %678 = vadd.xlane.f32.xlu0 %v668_v32  ;;  %v671_v37 = vmul.f32 %v1261_v29, %v1261_v29 }
 0x58c   :  { %v647_v38 = vpop.xlane.xlu0 %646 }
 0x58d   :  { %v1269_v39 = vsub.f32 %v631_v60, %v657_v36  ;;  %v656_v40 = vmul.f32 0.0078125, %v647_v38  ;;  %684 = vadd.xlane.f32.xlu1 %v671_v37  ;;  %v670_v43 = vmul.f32 %v1265_v34, %v1265_v34 }
 0x58f   :  { %v1273_v44 = vsub.f32 %v626_v13, %v656_v40  ;;  %682 = vadd.xlane.f32.xlu0 %v670_v43  ;;  %v673_v45 = vmul.f32 %v1269_v39, %v1269_v39 }
 0x591   :  { %688 = vadd.xlane.f32.xlu1 %v673_v45  ;;  %v672_v47 = vmul.f32 %v1273_v44, %v1273_v44 }
 0x593   :  { %686 = vadd.xlane.f32.xlu0 %v672_v47 }
 0x60a   :  { %v677_v48 = vpop.xlane.xlu1 %676 }
 0x60b   :  { %v691_v49 = vmul.f32 0.0078125, %v677_v48 }
 0x60c   :  { %v675_v54 = vpop.xlane.xlu0 %674 }
 0x60d   :  { %v699_v55 = vadd.f32 1e-05, %v691_v49  ;;  %v690_v56 = vmul.f32 0.0078125, %v675_v54 }
 0x60f   :  { %1034 = vrsqrt.f32 %v699_v55  ;;  %v698_v31 = vadd.f32 1e-05, %v690_v56 }
 0x611   :  { %1036 = vrsqrt.f32 %v698_v31 }
 0x612   :  { %v681_v35 = vpop.xlane.xlu1 %680 }
 0x613   :  { %v693_v57 = vmul.f32 0.0078125, %v681_v35 }
 0x614   :  { %v679_v58 = vpop.xlane.xlu0 %678 }
 0x615   :  { %v701_v62 = vadd.f32 1e-05, %v693_v57  ;;  %v692_v63 = vmul.f32 0.0078125, %v679_v58 }
 0x616   :  { %v685_v42 = vpop.xlane.xlu1 %684 }
 0x617   :  { %1038 = vrsqrt.f32 %v701_v62  ;;  %v700_v0 = vadd.f32 1e-05, %v692_v63  ;;  %v695_v41 = vmul.f32 0.0078125, %v685_v42 }
 0x618   :  { %v683_v1 = vpop.xlane.xlu0 %682 }
 0x619   :  { %1040 = vrsqrt.f32 %v700_v0  ;;  %v703_v50 = vadd.f32 1e-05, %v695_v41  ;;  %v694_v51 = vmul.f32 0.0078125, %v683_v1 }
 0x61a   :  { %v689_v2 = vpop.xlane.xlu1 %688 }
 0x61b   :  { %1042 = vrsqrt.f32 %v703_v50  ;;  %v702_v3 = vadd.f32 1e-05, %v694_v51  ;;  %v697_v6 = vmul.f32 0.0078125, %v689_v2 }
 0x61c   :  { %v1035_v59 = vpop.eup %1034  ;;  %v687_v7 = vpop.xlane.xlu0 %686 }
 0x61d   :  { %v715_v8 = vmul.f32 %v1035_v59, %v1247_v16  ;;  %1044 = vrsqrt.f32 %v702_v3  ;;  %v705_v52 = vadd.f32 1e-05, %v697_v6  ;;  %v696_v53 = vmul.f32 0.0078125, %v687_v7 }
 0x61e   :  { %v1037_v9 = vpop.eup %1036 }
 0x61f   :  { %v723_v46 = vmax.f32 %v715_v8, 0.0  ;;  %v714_v10 = vmul.f32 %v1037_v9, %v1249_v17  ;;  %1046 = vrsqrt.f32 %v705_v52  ;;  %v704_v11 = vadd.f32 1e-05, %v696_v53 }
 0x621   :  { %731 = vst [vmem:[#allocation9 + $0x8] sm:$0xff] %v723_v46  ;;  %v722_v60 = vmax.f32 %v714_v10, 0.0  ;;  %1048 = vrsqrt.f32 %v704_v11 }
 0x623   :  { %730 = vst [vmem:[#allocation9] sm:$0xff] %v722_v60 }
 0x624   :  { %v1039_v61 = vpop.eup %1038 }
 0x625   :  { %v717_v13 = vmul.f32 %v1039_v61, %v1255_v22 }
 0x626   :  { %v1041_v14 = vpop.eup %1040 }
 0x627   :  { %v725_v15 = vmax.f32 %v717_v13, 0.0  ;;  %v716_v4 = vmul.f32 %v1041_v14, %v1257_v25 }
 0x628   :  { %v1043_v16 = vpop.eup %1042 }
 0x629   :  { %733 = vst [vmem:[#allocation9 + $0x18] sm:$0xff] %v725_v15  ;;  %v724_v5 = vmax.f32 %v716_v4, 0.0  ;;  %v719_v18 = vmul.f32 %v1043_v16, %v1261_v29 }
 0x62a   :  { %v1045_v19 = vpop.eup %1044 }
 0x62b   :  { %732 = vst [vmem:[#allocation9 + $0x10] sm:$0xff] %v724_v5  ;;  %v727_v17 = vmax.f32 %v719_v18, 0.0  ;;  %v718_v20 = vmul.f32 %v1045_v19, %v1265_v34 }
 0x62c   :  { %v1047_v12 = vpop.eup %1046 }
 0x62d   :  { %735 = vst [vmem:[#allocation9 + $0x28] sm:$0xff] %v727_v17  ;;  %v726_v21 = vmax.f32 %v718_v20, 0.0  ;;  %v721_v23 = vmul.f32 %v1047_v12, %v1269_v39 }
 0x62e   :  { %v1049_v22 = vpop.eup %1048 }
 0x62f   :  { %734 = vst [vmem:[#allocation9 + $0x20] sm:$0xff] %v726_v21  ;;  %v729_v24 = vmax.f32 %v721_v23, 0.0  ;;  %v720_v25 = vmul.f32 %v1049_v22, %v1273_v44 }
 0x631   :  { %737 = vst [vmem:[#allocation9 + $0x38] sm:$0xff] %v729_v24  ;;  %v728_v26 = vmax.f32 %v720_v25, 0.0 }
 0x633   :  { %736 = vst [vmem:[#allocation9 + $0x30] sm:$0xff] %v728_v26 }
 0x634   :  { %1101 = shalt.err (!%p1098_p0)
}
 0x635   :  { %749 = dma.vmem_to_hbm [thread:$0]  %s744_s30, 1024, %s1297_s4, [#allocation6], %s1117_s0, %s1117_s0, %s1118_s18  }
 0x636   :  { %1114 = dma.done.wait [#allocation6], 1024  }
 0x637   :  { %1115 = vsyncadd [#allocation6], 4294966272 }
 0x638   :  { %753 = vsyncpa [#allocation5], 1 }
 0x639   :  { %754 = vsyncpa [#allocation8], 1 }
 0x63a   :  { %755 = vsyncpa [#allocation6], 1 }

</bundles_post_ra>
